<compile_context>
chip_gen: v5e
topology: v5e:2x2
jax: 0.10.0
libtpu: 0.0.40
codegen_flags: <defaults>
</compile_context>

<pallas_src>
import jax
import jax.numpy as jnp
from jax.experimental import pallas as pl
from jax.experimental.pallas import tpu as pltpu


def classifier_kernel(x_ref, w_ref, b_ref, mask_ref, out_ref):
    # x_ref:    (TM, H) activation row tile (streamed, double-buffered) [VMEM]
    # w_ref:    (H, 1)  Linear weight, transposed, grid-resident        [VMEM]
    # b_ref:    (1, 1)  Linear bias scalar                              [SMEM]
    # mask_ref: (TM, 1) mask tile                                       [VMEM]
    # out_ref:  (TM, 1) scores tile                                     [VMEM]
    # MXU mat-vec with f32 accumulation (works for f32 or bf16 inputs).
    h = jnp.dot(x_ref[...], w_ref[...], preferred_element_type=jnp.float32)
    scores = jax.nn.sigmoid(h + b_ref[0, 0]) * mask_ref[...].astype(jnp.float32)
    out_ref[...] = scores.astype(out_ref.dtype)


def _vmem_budgets():
    """X double-buffer byte budget + explicit scoped-VMEM limit, per chip."""
    try:
        phys = int(pltpu.get_tpu_info().vmem_capacity_bytes)
    except Exception:
        phys = 64 * 1024 * 1024          # conservative fallback (v7x per-TC)
    x_budget = int(phys * 0.40)          # v5e/v6e (~128 MiB) -> ~51 MiB; v7x (64 MiB) -> ~25 MiB
    vmem_limit = min(int(phys * 0.75), x_budget + 16 * 1024 * 1024)
    return x_budget, vmem_limit


def classifier_forward(x, w, b, mask, *, block_rows=2048):
    """Forward pass of Classifier: sigmoid(x @ w.T + b) * mask.

    x:    (B, S, H)  activations (f32 or bf16 — bf16 halves HBM traffic)
    w:    (1, H)     nn.Linear weight (out_features=1)
    b:    (1,) or (1, 1) nn.Linear bias
    mask: (B, S)     multiplicative mask
    returns (B, S)
    """
    B, S, H = x.shape
    R = B * S
    itemsize = jnp.dtype(x.dtype).itemsize

    x_budget, vmem_limit = _vmem_budgets()

    # Rows per tile: clamp by the *byte* budget (double-buffered), multiple
    # of 8 (sublane).  8 rows is the minimum legal tile; for any realistic H
    # that still sits far below physical VMEM.
    row_bytes = H * itemsize
    rows_fit = max(8, ((x_budget // 2) // max(1, row_bytes)) // 8 * 8)
    tm = min(max(8, (block_rows // 8) * 8), rows_fit)

    if R <= 8:
        tm = R  # single full-extent block (always layout-legal)
    else:
        # Guarantee >= 2 grid steps so both v7x TensorCores get work.
        half_rows = ((-(-R // 2)) + 7) // 8 * 8
        tm = max(8, min(tm, half_rows))

    grid = int(pl.cdiv(R, tm))

    x2 = x.reshape(R, H)                                  # no padding / no copy
    m2 = mask.reshape(R, 1)
    wt = jnp.asarray(w).reshape(H, 1).astype(x.dtype)     # (H, 1), VMEM-resident
    b2 = jnp.asarray(b, jnp.float32).reshape(1, 1)        # SMEM scalar

    out = pl.pallas_call(
        classifier_kernel,
        out_shape=jax.ShapeDtypeStruct((R, 1), x.dtype),
        grid_spec=pltpu.PrefetchScalarGridSpec(
            num_scalar_prefetch=0,
            grid=(grid,),
            in_specs=[
                pl.BlockSpec((tm, H), lambda i: (i, 0)),   # x row tile (ragged last block OK)
                pl.BlockSpec((H, 1), lambda i: (0, 0)),    # weight (resident)
                pl.BlockSpec(memory_space=pltpu.SMEM),     # bias scalar
                pl.BlockSpec((tm, 1), lambda i: (i, 0)),   # mask tile
            ],
            out_specs=pl.BlockSpec((tm, 1), lambda i: (i, 0)),
        ),
        compiler_params=pltpu.CompilerParams(
            dimension_semantics=("parallel",),             # rows independent
            vmem_limit_bytes=int(vmem_limit),
        ),
    )(x2, wt, b2, m2)

    return out.reshape(B, S)


if __name__ == "__main__":
    # --- Small shapes consistent with the module: batch=2, seq=8, hidden=32.
    B, S, H = 2, 8, 32
    key = jax.random.PRNGKey(0)
    kx, km, kw, kb = jax.random.split(key, 4)

    x = jax.random.normal(kx, (B, S, H), dtype=jnp.float32)
    mask = (jax.random.uniform(km, (B, S)) > 0.3).astype(jnp.float32)
    bound = 1.0 / (H ** 0.5)
    w = jax.random.uniform(kw, (1, H), minval=-bound, maxval=bound, dtype=jnp.float32)
    b = jax.random.uniform(kb, (1,), minval=-bound, maxval=bound, dtype=jnp.float32)

    out = jax.block_until_ready(classifier_forward(x, w, b, mask))
    ref = jax.nn.sigmoid(jnp.einsum("bsh,h->bs", x, w[0]) + b[0]) * mask
    assert out.shape == (B, S)
    assert jnp.allclose(out, ref, atol=1e-5, rtol=1e-5)

    # --- Multi-tile path with a ragged (unpadded) last block.
    B2, S2, H2 = 4, 100, 256
    k2x, k2m, k2w, k2b = jax.random.split(jax.random.PRNGKey(1), 4)
    x2 = jax.random.normal(k2x, (B2, S2, H2), dtype=jnp.float32)
    mask2 = (jax.random.uniform(k2m, (B2, S2)) > 0.3).astype(jnp.float32)
    bound2 = 1.0 / (H2 ** 0.5)
    w2 = jax.random.uniform(k2w, (1, H2), minval=-bound2, maxval=bound2, dtype=jnp.float32)
    b2 = jax.random.uniform(k2b, (1,), minval=-bound2, maxval=bound2, dtype=jnp.float32)

    out2 = jax.block_until_ready(classifier_forward(x2, w2, b2, mask2, block_rows=128))
    ref2 = jax.nn.sigmoid(jnp.einsum("bsh,h->bs", x2, w2[0]) + b2[0]) * mask2
    assert out2.shape == (B2, S2)
    assert jnp.allclose(out2, ref2, atol=1e-5, rtol=1e-5)

    # --- bf16 activation path (half HBM traffic, f32 accumulation on the MXU).
    B3, S3, H3 = 2, 64, 128
    k3x, k3m, k3w, k3b = jax.random.split(jax.random.PRNGKey(2), 4)
    x3 = jax.random.normal(k3x, (B3, S3, H3), dtype=jnp.float32).astype(jnp.bfloat16)
    mask3 = (jax.random.uniform(k3m, (B3, S3)) > 0.3).astype(jnp.float32)
    bound3 = 1.0 / (H3 ** 0.5)
    w3 = jax.random.uniform(k3w, (1, H3), minval=-bound3, maxval=bound3, dtype=jnp.float32)
    b3 = jax.random.uniform(k3b, (1,), minval=-bound3, maxval=bound3, dtype=jnp.float32)

    out3 = jax.block_until_ready(classifier_forward(x3, w3, b3, mask3))
    ref3 = jax.nn.sigmoid(
        jnp.einsum("bsh,h->bs", x3.astype(jnp.float32), w3[0]) + b3[0]) * mask3
    assert out3.shape == (B3, S3)
    assert jnp.allclose(out3.astype(jnp.float32), ref3, atol=2e-2, rtol=2e-2)

    print("KERNEL_OK")
</pallas_src>

<mosaic_0001>
module attributes {stable_mosaic.version = 11 : i64} {
  func.func @classifier_kernel(%arg0: i32, %arg1: memref<8x32xf32, #tpu.memory_space<vmem>>, %arg2: memref<32x1xf32, #tpu.memory_space<vmem>>, %arg3: memref<1x1xf32, #tpu.memory_space<smem>>, %arg4: memref<8x1xf32, #tpu.memory_space<vmem>>, %arg5: memref<8x1xf32, #tpu.memory_space<vmem>>) attributes {dimension_semantics = [#tpu.dimension_semantics<parallel>], iteration_bounds = array<i64: 2>, scalar_prefetch = 0 : i64, scratch_operands = 0 : i64, tpu.core_type = #tpu.core_type<tc>, window_params = [{transform_indices = @transform_0, window_bounds = array<i64: 8, 32>}, {pipeline_mode = #tpu.pipeline_mode<synchronous>, transform_indices = @transform_1, window_bounds = array<i64: 32, 1>}, {transform_indices = @transform_2, window_bounds = array<i64: 1, 1>}, {transform_indices = @transform_3, window_bounds = array<i64: 8, 1>}, {transform_indices = @transform_4, window_bounds = array<i64: 8, 1>}]} {
    %c0 = arith.constant 0 : index
    %c0_0 = arith.constant 0 : index
    %0 = vector.load %arg1[%c0, %c0_0] : memref<8x32xf32, #tpu.memory_space<vmem>>, vector<8x32xf32>
    %c0_1 = arith.constant 0 : index
    %c0_2 = arith.constant 0 : index
    %1 = vector.load %arg2[%c0_1, %c0_2] : memref<32x1xf32, #tpu.memory_space<vmem>>, vector<32x1xf32>
    %cst = arith.constant dense<0.000000e+00> : vector<8x1xf32>
    %2 = tpu.matmul %0, %1, %cst {dimension_numbers = #tpu.dot_dimension_numbers<[1], [0], [0], [1], [0, 0, 1, 1], [], []>} : vector<8x32xf32>, vector<32x1xf32>, vector<8x1xf32> -> vector<8x1xf32>
    %c0_3 = arith.constant 0 : index
    %c0_4 = arith.constant 0 : index
    %3 = memref.load %arg3[%c0_3, %c0_4] : memref<1x1xf32, #tpu.memory_space<smem>>
    %4 = vector.broadcast %3 : f32 to vector<8x1xf32>
    %5 = arith.addf %2, %4 : vector<8x1xf32>
    %6 = arith.negf %5 : vector<8x1xf32>
    %7 = math.exp %6 : vector<8x1xf32>
    %cst_5 = arith.constant 1.000000e+00 : f32
    %8 = vector.broadcast %cst_5 : f32 to vector<8x1xf32>
    %9 = arith.addf %8, %7 : vector<8x1xf32>
    %10 = arith.divf %8, %9 : vector<8x1xf32>
    %c0_6 = arith.constant 0 : index
    %c0_7 = arith.constant 0 : index
    %11 = vector.load %arg4[%c0_6, %c0_7] : memref<8x1xf32, #tpu.memory_space<vmem>>, vector<8x1xf32>
    %12 = arith.mulf %10, %11 : vector<8x1xf32>
    %c0_8 = arith.constant 0 : index
    %c0_9 = arith.constant 0 : index
    %13 = vector.load %arg5[%c0_8, %c0_9] : memref<8x1xf32, #tpu.memory_space<vmem>>, vector<8x1xf32>
    tpu.vector_store %arg5[%c0_8, %c0_9], %12 {strides = array<i32>} : memref<8x1xf32, #tpu.memory_space<vmem>>, vector<8x1xf32>,
    return
  }
  func.func @transform_0(%arg0: i32) -> (i32, i32) {
    %c0_i32 = arith.constant 0 : i32
    %c0_i32_0 = arith.constant 0 : i32
    return %arg0, %c0_i32 : i32, i32
  }
  func.func @transform_1(%arg0: i32) -> (i32, i32) {
    %c0_i32 = arith.constant 0 : i32
    %c0_i32_0 = arith.constant 0 : i32
    %c0_i32_1 = arith.constant 0 : i32
    return %c0_i32, %c0_i32_0 : i32, i32
  }
  func.func @transform_2(%arg0: i32) -> (i32, i32) {
    %c0_i32 = arith.constant 0 : i32
    %c0_i32_0 = arith.constant 0 : i32
    %c0_i32_1 = arith.constant 0 : i32
    return %c0_i32, %c0_i32_0 : i32, i32
  }
  func.func @transform_3(%arg0: i32) -> (i32, i32) {
    %c0_i32 = arith.constant 0 : i32
    %c0_i32_0 = arith.constant 0 : i32
    return %arg0, %c0_i32 : i32, i32
  }
  func.func @transform_4(%arg0: i32) -> (i32, i32) {
    %c0_i32 = arith.constant 0 : i32
    %c0_i32_0 = arith.constant 0 : i32
    return %arg0, %c0_i32 : i32, i32
  }
}

</mosaic_0001>

<bundles_post_ra>
// kernel: tpu_custom_call.1
= control target key start
LH: loop header
LB: loop body
LE: loop exit
PB: predicated region body
PF: predicated region fallthrough
CT: control target
= control target key end

     0   :  { %s390_s17 = smov 0   ;;  %s427_s0 = inlined_call_operand.vmem [shape: f32[16,32], index: 0, kind: input, shape index: {}]   ;;  %s428_s1 = inlined_call_operand.vmem [shape: f32[32,1], index: 1, kind: input, shape index: {}]   ;;  %s429_s2 = inlined_call_operand.<no memory space> [shape: f32[1,1], index: 2, kind: input, shape index: {}]   ;;  %s430_s3 = inlined_call_operand.vmem [shape: f32[16,1], index: 3, kind: input, shape index: {}]   ;;  %s431_s4 = inlined_call_operand.vmem [shape: f32[16,1], index: 4, kind: output, shape index: {}]  }
   0x1   :  { %9 = sst [smem:[#allocation2]] %s429_s2 }
   0x2 LB: > { %s330_s18 = sadd.s32 4294967295, %s360_s17   ;;  %p334_p0 = scmp.ge.s32.totalorder %s360_s17, 1  ;;  %s360_s17 = sphi %s390_s17, %s15_s17  }
   0x3   : > { %p171_p1 = scmp.lt.s32.totalorder %s360_s17, 3 }
   0x5   : > { %p172_p2 = pnand %p334_p0, %p171_p1 }
   0x6   : > { %p199_p3 = scmp.lt.s32.totalorder (!%p172_p2), %s330_s18, 1  ;;  %s216_s30 = sld [smem:[#allocation2]] (!%p172_p2) }
   0x7   : > { %175 = sbr.rel (%p172_p2) target bundleno = 179 (0xb3), region = 36 }
   0xc   : > { %v215_v0 = vld [vmem:[%s428_s1 + $0x18] sm:$0xff]  ;;  %v214_v1 = vld [vmem:[%s428_s1 + $0x10] sm:$0xff]  ;;  %v213_v2 = vld [vmem:[%s428_s1 + $0x8] sm:$0xff]  ;;  %s433_s18 = smov (!%p199_p3, %s330_s18), 1  ;;  %vm218_vm0 = vcmask 261120   ;;  %v217_v5 = vstv %s216_s30  ;;  %vm263_vm5 = vcmask 7168  }
   0xd   : > { %234 = vmatpush.msra.mxu0 %v215_v0  ;;  %v212_v3 = vld [vmem:[%s428_s1] sm:$0xff]  ;;  %s410_s26 = sshll.u32 %s433_s18, 3 }
   0xe   : > { %s202_s29 = scalar_lea.vmem %s427_s0, %s410_s26  ;;  %s206_s7 = scalar_lea.vmem %s430_s3, %s410_s26 }
   0xf   : > { %235 = vmatpush.msra.mxu0 %v214_v1  ;;  %v211_v4 = vld [vmem:[%s202_s29] sm:$0xff]  ;;  %s210_s10 = scalar_lea.vmem %s431_s4, %s410_s26 }
  0x10   : > { %v261_v18 = vld [vmem:[%s206_s7] sm:$0xff] }
  0x11   : > { %236 = vmatpush.msra.mxu0 %v213_v2 }
  0x13   : > { %237 = vmatpush.msra.mxu0 %v212_v3 }
  0x14   : > { %338 = vmatmul.msk.f32.vlgmr.msra.gmra.mxu0 %vm218_vm0, %v211_v4 }
  0x91   : > { %v239_v6 = vpop.f32.mrf.mxu0 }
  0x92   : > { %v240_v7 = vadd.f32 %v239_v6, %v217_v5 }
  0x94   : > { %v339_v8 = vmul.f32 -1.442695, %v240_v7 }
  0x96   : > { %350 = vpow2.f32 %v339_v8 }
  0x9c   : > { %v351_v9 = vpop.eup %350 }
  0x9d   : > { %v245_v10 = vadd.f32 1.0, %v351_v9 }
  0x9f   : > { %352 = vrcp.f32 %v245_v10  ;;  %v257_v14 = vand.u32 2147483648, %v245_v10  ;;  %v255_v16 = vand.u32 2147483647, %v245_v10  ;;  %vm251_vm2 = vweird.f32 %v245_v10 }
  0xa1   : > { %v258_v19 = vor.u32 1.1754944e-38, %v257_v14  ;;  %vm256_vm4 = vcmp.eq.f32.partialorder %v255_v16, 8.507059e+37 }
  0xa5   : > { %v353_v11 = vpop.eup %352 }
  0xa6   : > { %v247_v12 = vmul.f32 %v353_v11, %v245_v10  ;;  %vm252_vm1 = vweird.f32 %v353_v11 }
  0xa7   : > { %vm253_vm3 = vmor %vm251_vm2, %vm252_vm1 }
  0xa8   : > { %v248_v13 = vsub.f32 1.0, %v247_v12 }
  0xaa   : > { %v249_v15 = vmul.f32 %v353_v11, %v248_v13 }
  0xac   : > { %v250_v17 = vadd.f32 %v353_v11, %v249_v15 }
  0xae   : > { %v254_v20 = vsel %vm253_vm3, %v353_v11, %v250_v17 }
  0xaf   : > { %v259_v21 = vsel %vm256_vm4, %v258_v19, %v254_v20 }
  0xb0   : > { %v262_v22 = vmul.f32 %v261_v18, %v259_v21 }
  0xb2   : > { %264 = vst.msk [vmem:[%s210_s10] sm:$0xff] %vm263_vm5, %v262_v22 }
  0xb3 PF: > { %s15_s17 = sadd.s32 1, %s360_s17  }
  0xb4   : > { %p12_p4 = scmp.ge.s32.totalorder %s15_s17, 4  }
  0xb6   :  { %14 = sbr.rel (!%p12_p4) target bundleno = 2 (0x2), region = 69 }

</bundles_post_ra>
